<compile_context>
chip_gen: v7x
topology: tpu7x:2x2x1
jax: 0.10.0
libtpu: 0.0.40
codegen_flags: <defaults>
</compile_context>

<pallas_src>
import jax
import jax.numpy as jnp
from jax import lax
from jax.experimental import pallas as pl
from jax.experimental.pallas import tpu as pltpu


def _w2v_sim_kernel(hyp_ref, ref_ref, out_ref):
    # hyp_ref: (Bb, H, T, D), ref_ref: (Bb, T, D), out_ref: (Bb, H) f32.
    # Fold the widening into the reduction — no full-block f32 materialization
    # via an explicit .astype on the whole tile.
    hyp_vec = jnp.sum(hyp_ref[...], axis=2, dtype=jnp.float32)    # (Bb, H, D)
    ref_vec = jnp.sum(ref_ref[...], axis=1, dtype=jnp.float32)    # (Bb, D)

    dots = jnp.sum(hyp_vec * ref_vec[:, None, :], axis=-1)        # (Bb, H)
    hyp_ss = jnp.sum(hyp_vec * hyp_vec, axis=-1)                  # (Bb, H)
    ref_ss = jnp.sum(ref_vec * ref_vec, axis=-1, keepdims=True)   # (Bb, 1)

    # Independent rsqrt guards (EUP slot): better f32 dynamic range than
    # rsqrt(hyp_ss * ref_ss), and zero vectors yield similarity 0.0 (spacy).
    hyp_inv = jnp.where(hyp_ss > 0.0, lax.rsqrt(hyp_ss), 0.0)     # (Bb, H)
    ref_inv = jnp.where(ref_ss > 0.0, lax.rsqrt(ref_ss), 0.0)     # (Bb, 1)

    out_ref[...] = (dots * hyp_inv * ref_inv).astype(out_ref.dtype)


def _round_up(x: int, m: int) -> int:
    return ((x + m - 1) // m) * m


def _per_row_vmem_bytes(H: int, T: int, D: int, itemsize: int) -> int:
    """Approximate VMEM bytes consumed per batch row inside one grid step:
    double-buffered input blocks + f32 widened temporaries + pooled f32
    vectors/products + output."""
    hyp_row = H * T * D * itemsize
    ref_row = T * D * itemsize
    return (2 * (hyp_row + ref_row)        # double-buffered HBM blocks
            + 4 * (H * T * D + T * D)      # f32 widened temporaries (upper bound)
            + 8 * (H * D + D)              # pooled f32 vectors / products
            + 8 * H)                       # output block + sim temporaries


def _choose_batch_block(B: int, H: int, T: int, D: int, itemsize: int, *,
                        vmem_target: int = 40 << 20,
                        max_block_bytes: int = 9 << 20,
                        min_steps: int = 4) -> int:
    """Pick Bb (multiple of 8) so the working set fits the VMEM target, the
    hyp block is big enough to amortize per-step overhead, and the grid keeps
    >= min_steps steps for large B (megacore sharding on v7x)."""
    hyp_row = max(H * T * D * itemsize, 1)
    per_row = max(_per_row_vmem_bytes(H, T, D, itemsize), 1)
    bb = min(vmem_target // per_row, max_block_bytes // hyp_row)
    bb = min(bb, _round_up(B, 8))            # never larger than the padded batch
    bb = max(8, (bb // 8) * 8)               # sublane-aligned
    if B >= min_steps * 8:                   # keep the grid multi-step
        bb = min(bb, max(8, (B // min_steps) // 8 * 8))
    # Prefer an exact divisor of B (avoids padded batch rows) if one exists
    # within 2x of the cap.
    for cand in range(bb, 7, -8):
        if B % cand == 0:
            if cand * 2 >= bb:
                bb = cand
            break
    return int(bb)


def word2vec_similarity(hyp_tok: jax.Array, ref_tok: jax.Array) -> jax.Array:
    """hyp_tok: [B, H, T, D], ref_tok: [B, T, D] -> similarities [B, H] (f32)."""
    B, H, T, D = hyp_tok.shape
    assert ref_tok.shape == (B, T, D)
    itemsize = hyp_tok.dtype.itemsize

    # Pad T to the sublane-packing multiple (16 for bf16, 8 for f32) and D to
    # a lane multiple (128).  Zero padding is exact for sum-pool + cosine.
    t_mult = max(8, 32 // itemsize)
    Tp, Dp = _round_up(T, t_mult), _round_up(D, 128)
    if (Tp, Dp) != (T, D):
        hyp_tok = jnp.pad(hyp_tok, ((0, 0), (0, 0), (0, Tp - T), (0, Dp - D)))
        ref_tok = jnp.pad(ref_tok, ((0, 0), (0, Tp - T), (0, Dp - D)))

    Bb = _choose_batch_block(B, H, Tp, Dp, itemsize)

    # Zero-pad the batch to a multiple of Bb (never a whole-batch single-block
    # fallback); padded rows hit the zero-norm guard (sim == 0) and are sliced
    # off below.
    Bp = _round_up(B, Bb)
    if Bp != B:
        hyp_tok = jnp.pad(hyp_tok, ((0, Bp - B), (0, 0), (0, 0), (0, 0)))
        ref_tok = jnp.pad(ref_tok, ((0, Bp - B), (0, 0), (0, 0)))

    # VMEM limit sized from the actual working set (with slack for Mosaic
    # internal scratch), capped at 48 MiB so it stays safe on v7x's 64 MiB/TC
    # while still overriding v5e's 16 MiB default scoped limit.
    hyp_blk = Bb * H * Tp * Dp * itemsize
    ref_blk = Bb * Tp * Dp * itemsize
    out_blk = Bb * H * 4
    f32_tmp = (Bb * H * Tp * Dp + Bb * Tp * Dp) * 4
    pooled = (Bb * H * Dp + Bb * Dp) * 4 * 2
    working_set = 2 * (hyp_blk + ref_blk + out_blk) + f32_tmp + pooled
    vmem_limit = int(min(max(working_set + (4 << 20), 16 << 20), 48 << 20))

    out = pl.pallas_call(
        _w2v_sim_kernel,
        out_shape=jax.ShapeDtypeStruct((Bp, H), jnp.float32),
        grid_spec=pltpu.PrefetchScalarGridSpec(
            num_scalar_prefetch=0,
            grid=(Bp // Bb,),
            in_specs=[
                pl.BlockSpec((Bb, H, Tp, Dp), lambda b: (b, 0, 0, 0)),
                pl.BlockSpec((Bb, Tp, Dp), lambda b: (b, 0, 0)),
            ],
            out_specs=pl.BlockSpec((Bb, H), lambda b: (b, 0)),
        ),
        compiler_params=pltpu.CompilerParams(
            dimension_semantics=("parallel",),
            vmem_limit_bytes=vmem_limit,
        ),
    )(hyp_tok, ref_tok)
    return out[:B]


def _reference_similarity(hyp_tok, ref_tok):
    """Pure-JAX reference of the same math (spacy mean-pool + cosine)."""
    hyp_vec = jnp.mean(hyp_tok.astype(jnp.float32), axis=2)   # (B, H, D)
    ref_vec = jnp.mean(ref_tok.astype(jnp.float32), axis=1)   # (B, D)
    dots = jnp.einsum("bhd,bd->bh", hyp_vec, ref_vec)
    denom = (jnp.linalg.norm(hyp_vec, axis=-1)
             * jnp.linalg.norm(ref_vec, axis=-1)[:, None])
    return jnp.where(denom > 0.0, dots / denom, 0.0)


if __name__ == "__main__":
    # Small, deterministic synthetic setup.  spacy 'lg' vectors are 300-d; we
    # use D=128 (lane-aligned) and T=16 (bf16 packs 16 rows per vreg).  The
    # wrapper would zero-pad unaligned T/D anyway.
    B = 2     # batch of (hypotheses, reference) pairs
    H = 4     # hypotheses per reference
    T = 16    # tokens per sentence (padded)
    D = 128   # embedding dim
    V = 64    # vocabulary size of the synthetic word2vec table

    key = jax.random.PRNGKey(0)
    k_emb, k_hyp_ids, k_ref_ids = jax.random.split(key, 3)

    # Deterministic synthetic word2vec embedding table (stands in for spacy
    # vectors), stored in bf16 in HBM to halve input bandwidth.
    emb_table = jax.random.normal(k_emb, (V, D), dtype=jnp.float32).astype(jnp.bfloat16)

    # Deterministic token ids and plain-JAX embedding lookup (glue).
    hyp_ids = jax.random.randint(k_hyp_ids, (B, H, T), 0, V)
    ref_ids = jax.random.randint(k_ref_ids, (B, T), 0, V)
    hyp_tok = emb_table[hyp_ids]     # [B, H, T, D] bf16
    ref_tok = emb_table[ref_ids]     # [B, T, D]    bf16

    sims = word2vec_similarity(hyp_tok, ref_tok)
    sims = jax.block_until_ready(sims)

    ref = _reference_similarity(hyp_tok, ref_tok)
    assert sims.shape == (B, H)
    assert jnp.allclose(sims, ref, atol=1e-4, rtol=1e-4)

    print("KERNEL_OK")
</pallas_src>

<mosaic_0001>
module attributes {stable_mosaic.version = 11 : i64} {
  func.func @_w2v_sim_kernel(%arg0: i32, %arg1: memref<8x4x16x128xbf16, #tpu.memory_space<vmem>>, %arg2: memref<8x16x128xbf16, #tpu.memory_space<vmem>>, %arg3: memref<8x4xf32, #tpu.memory_space<vmem>>) attributes {dimension_semantics = [#tpu.dimension_semantics<parallel>], iteration_bounds = array<i64: 1>, scalar_prefetch = 0 : i64, scratch_operands = 0 : i64, tpu.core_type = #tpu.core_type<tc>, window_params = [{transform_indices = @transform_0, window_bounds = array<i64: 8, 4, 16, 128>}, {transform_indices = @transform_1, window_bounds = array<i64: 8, 16, 128>}, {transform_indices = @transform_2, window_bounds = array<i64: 8, 4>}]} {
    %c0 = arith.constant 0 : index
    %c0_0 = arith.constant 0 : index
    %c0_1 = arith.constant 0 : index
    %c0_2 = arith.constant 0 : index
    %0 = vector.load %arg1[%c0, %c0_0, %c0_1, %c0_2] : memref<8x4x16x128xbf16, #tpu.memory_space<vmem>>, vector<8x4x16x128xbf16>
    %1 = arith.extf %0 : vector<8x4x16x128xbf16> to vector<8x4x16x128xf32>
    %cst = arith.constant dense<0.000000e+00> : vector<8x4x128xf32>
    %2 = vector.multi_reduction <add>, %1, %cst [2] : vector<8x4x16x128xf32> to vector<8x4x128xf32>
    %c0_3 = arith.constant 0 : index
    %c0_4 = arith.constant 0 : index
    %c0_5 = arith.constant 0 : index
    %3 = vector.load %arg2[%c0_3, %c0_4, %c0_5] : memref<8x16x128xbf16, #tpu.memory_space<vmem>>, vector<8x16x128xbf16>
    %4 = arith.extf %3 : vector<8x16x128xbf16> to vector<8x16x128xf32>
    %cst_6 = arith.constant dense<0.000000e+00> : vector<8x128xf32>
    %5 = vector.multi_reduction <add>, %4, %cst_6 [1] : vector<8x16x128xf32> to vector<8x128xf32>
    %6 = vector.shape_cast %5 : vector<8x128xf32> to vector<8x1x128xf32>
    %7 = vector.broadcast %6 : vector<8x1x128xf32> to vector<8x4x128xf32>
    %8 = arith.mulf %2, %7 : vector<8x4x128xf32>
    %cst_7 = arith.constant dense<0.000000e+00> : vector<8x4xf32>
    %9 = vector.multi_reduction <add>, %8, %cst_7 [2] : vector<8x4x128xf32> to vector<8x4xf32>
    %10 = arith.mulf %2, %2 : vector<8x4x128xf32>
    %cst_8 = arith.constant dense<0.000000e+00> : vector<8x4xf32>
    %11 = vector.multi_reduction <add>, %10, %cst_8 [2] : vector<8x4x128xf32> to vector<8x4xf32>
    %12 = arith.mulf %5, %5 : vector<8x128xf32>
    %cst_9 = arith.constant dense<0.000000e+00> : vector<8xf32>
    %13 = vector.multi_reduction <add>, %12, %cst_9 [1] : vector<8x128xf32> to vector<8xf32>
    %14 = vector.shape_cast %13 : vector<8xf32> to vector<8x1xf32>
    %cst_10 = arith.constant 0.000000e+00 : f32
    %15 = vector.broadcast %cst_10 : f32 to vector<8x4xf32>
    %16 = arith.cmpf ogt, %11, %15 : vector<8x4xf32>
    %17 = math.rsqrt %11 : vector<8x4xf32>
    %cst_11 = arith.constant 0.000000e+00 : f32
    %18 = vector.broadcast %cst_11 : f32 to vector<8x4xf32>
    %19 = arith.select %16, %17, %18 : vector<8x4xi1>, vector<8x4xf32>
    %cst_12 = arith.constant 0.000000e+00 : f32
    %20 = vector.broadcast %cst_12 : f32 to vector<8x1xf32>
    %21 = arith.cmpf ogt, %14, %20 : vector<8x1xf32>
    %22 = math.rsqrt %14 : vector<8x1xf32>
    %cst_13 = arith.constant 0.000000e+00 : f32
    %23 = vector.broadcast %cst_13 : f32 to vector<8x1xf32>
    %24 = arith.select %21, %22, %23 : vector<8x1xi1>, vector<8x1xf32>
    %25 = arith.mulf %9, %19 : vector<8x4xf32>
    %26 = vector.broadcast %24 : vector<8x1xf32> to vector<8x4xf32>
    %27 = arith.mulf %25, %26 : vector<8x4xf32>
    %c0_14 = arith.constant 0 : index
    %c0_15 = arith.constant 0 : index
    %28 = vector.load %arg3[%c0_14, %c0_15] : memref<8x4xf32, #tpu.memory_space<vmem>>, vector<8x4xf32>
    tpu.vector_store %arg3[%c0_14, %c0_15], %27 {strides = array<i32>} : memref<8x4xf32, #tpu.memory_space<vmem>>, vector<8x4xf32>,
    return
  }
  func.func @transform_0(%arg0: i32) -> (i32, i32, i32, i32) {
    %c0_i32 = arith.constant 0 : i32
    %c0_i32_0 = arith.constant 0 : i32
    %c0_i32_1 = arith.constant 0 : i32
    %c0_i32_2 = arith.constant 0 : i32
    return %arg0, %c0_i32, %c0_i32_0, %c0_i32_1 : i32, i32, i32, i32
  }
  func.func @transform_1(%arg0: i32) -> (i32, i32, i32) {
    %c0_i32 = arith.constant 0 : i32
    %c0_i32_0 = arith.constant 0 : i32
    %c0_i32_1 = arith.constant 0 : i32
    return %arg0, %c0_i32, %c0_i32_0 : i32, i32, i32
  }
  func.func @transform_2(%arg0: i32) -> (i32, i32) {
    %c0_i32 = arith.constant 0 : i32
    %c0_i32_0 = arith.constant 0 : i32
    return %arg0, %c0_i32 : i32, i32
  }
}

</mosaic_0001>

<bundles_post_ra>
// kernel: tpu_custom_call.1
= control target key start
LH: loop header
LB: loop body
LE: loop exit
PB: predicated region body
PF: predicated region fallthrough
CT: control target
= control target key end

     0   :  { %7 = vsyncpa [#allocation3], 0  ;;  %s1602_s0 = inlined_call_operand.hbm [shape: bf16[8,4,16,128], index: 0, kind: input, shape index: {}]   ;;  %s1603_s1 = inlined_call_operand.hbm [shape: bf16[8,16,128], index: 1, kind: input, shape index: {}]   ;;  %s1604_s2 = inlined_call_operand.vmem [shape: f32[8,4], index: 2, kind: output, shape index: {}]  }
   0x1   :  { %8 = vsyncpa [#allocation5], 0  ;;  %s1214_s9 = smov [#allocation2]   ;;  %s1166_s13 = scalar_lea.hbm %s1602_s0, 4096 }
   0x2   :  { %s14_s10 = sshll.u32 %s1214_s9, 4  ;;  %p1167_p0 = scmp.ne.s32.totalorder %s1602_s0, %s1166_s13  ;;  %s15_s10 = int_to_ptr.vmem [resolvable:$true] %s14_s10 }
   0x3   :  { %p1170_p1 = scmp.lt.u32.totalorder %s1166_s13, %s1602_s0 }
   0x5   :  { %p1172_p2 = pnand %p1170_p1, %p1167_p0 }
   0x7   :  { %1175 = shalt.err (!%p1172_p2)
}
   0x8   :  { %s1176_s18 = scalar_lea.vmem %s15_s10, 4096  ;;  %p1181_p4 = scmp.lt.s32.totalorder %s15_s10, %s15_s10 }
   0x9   :  { %p1177_p3 = scmp.ne.s32.totalorder %s15_s10, %s1176_s18  ;;  %p1182_p5 = scmp.lt.s32.totalorder %s1176_s18, %s1176_s18 }
   0xb   :  { %p1183_p6 = por %p1182_p5, %p1181_p4 }
   0xd   :  { %p1184_p7 = pnand %p1183_p6, %p1177_p3 }
   0xf   :  { %1187 = shalt.err (!%p1184_p7)
}
  0x10   :  { %s1215_s19 = smov 64   ;;  %s1216_s20 = smov 4  }
  0x11   :  { %20 = dma.hbm_to_vmem [thread:$0]  %s1602_s0, 4096, %s15_s10, [#allocation3], %s1215_s19, %s1215_s19, %s1216_s20  }
  0x12   :  { %s1217_s23 = smov [#allocation4]   ;;  %s1188_s27 = scalar_lea.hbm %s1603_s1, 1024 }
  0x13   :  { %s26_s24 = sshll.u32 %s1217_s23, 4  ;;  %p1189_p8 = scmp.ne.s32.totalorder %s1603_s1, %s1188_s27  ;;  %s27_s24 = int_to_ptr.vmem [resolvable:$true] %s26_s24 }
  0x14   :  { %p1192_p9 = scmp.lt.u32.totalorder %s1188_s27, %s1603_s1 }
  0x16   :  { %p1194_p10 = pnand %p1192_p9, %p1189_p8 }
  0x18   :  { %1197 = shalt.err (!%p1194_p10)
}
  0x19   :  { %s1198_s4 = scalar_lea.vmem %s27_s24, 1024  ;;  %p1203_p12 = scmp.lt.s32.totalorder %s27_s24, %s27_s24 }
  0x1a   :  { %p1199_p11 = scmp.ne.s32.totalorder %s27_s24, %s1198_s4  ;;  %p1204_p13 = scmp.lt.s32.totalorder %s1198_s4, %s1198_s4 }
  0x1c   :  { %p1205_p0 = por %p1204_p13, %p1203_p12 }
  0x1e   :  { %p1206_p1 = pnand %p1205_p0, %p1199_p11 }
  0x20   :  { %1209 = shalt.err (!%p1206_p1)
}
  0x21   :  { %32 = dma.hbm_to_vmem [thread:$0]  %s1603_s1, 1024, %s27_s24, [#allocation5], %s1215_s19, %s1215_s19, %s1216_s20  }
  0x22   :  { %1210 = dma.done.wait [#allocation3], 4096  }
  0x23   :  { %1211 = vsyncadd [#allocation3], 4294963200 }
  0x24   :  { %1212 = dma.done.wait [#allocation5], 1024  }
  0x25   :  { %1213 = vsyncadd [#allocation5], 4294966272  ;;  %v1110_v0 = vld [vmem:[#allocation2 + $0x40] sm:$0xff]   ;;  %v1111_v1 = vld [vmem:[#allocation2 + $0x48] sm:$0xff]   ;;  %vm544_vm0 = vcmask 1041409   ;;  %vm547_vm1 = vcmask 1042434  }
  0x26   :  { %v1112_v2 = vld [vmem:[#allocation2 + $0x50] sm:$0xff]   ;;  %v977_v3 = vunpack.c.l.bf16 %v1110_v0  ;;  %v978_v4 = vunpack.c.h.bf16 %v1110_v0  ;;  %v981_v5 = vunpack.c.l.bf16 %v1111_v1  ;;  %v982_v6 = vunpack.c.h.bf16 %v1111_v1  ;;  %v1113_v7 = vld [vmem:[#allocation2 + $0x58] sm:$0xff]   ;;  %v944_v8 = vld [vmem:[#allocation2] sm:$0xff]  }
  0x27   :  { %v1103_v9 = vld [vmem:[#allocation2 + $0x8] sm:$0xff]   ;;  %v985_v10 = vunpack.c.l.bf16 %v1112_v2  ;;  %v986_v11 = vunpack.c.h.bf16 %v1112_v2  ;;  %v989_v12 = vunpack.c.l.bf16 %v1113_v7  ;;  %v990_v13 = vunpack.c.h.bf16 %v1113_v7  ;;  %v1104_v14 = vld [vmem:[#allocation2 + $0x10] sm:$0xff]   ;;  %v1105_v19 = vld [vmem:[#allocation2 + $0x18] sm:$0xff]  }
  0x28   :  { %v223_v15 = vadd.f32 %v978_v4, %v977_v3  ;;  %v230_v16 = vadd.f32 %v982_v6, %v981_v5  ;;  %v945_v17 = vunpack.c.l.bf16 %v944_v8  ;;  %v946_v18 = vunpack.c.h.bf16 %v944_v8  ;;  %v1118_v8 = vld [vmem:[#allocation2 + $0x80] sm:$0xff]  }
  0x29   :  { %v237_v20 = vadd.f32 %v986_v11, %v985_v10  ;;  %v244_v21 = vadd.f32 %v990_v13, %v989_v12  ;;  %v949_v22 = vunpack.c.l.bf16 %v1103_v9  ;;  %v950_v23 = vunpack.c.h.bf16 %v1103_v9 }
  0x2a   :  { %v224_v24 = vrot.slane %v223_v15, 4  ;;  %v231_v25 = vrot.slane %v230_v16, 4  ;;  %v953_v26 = vunpack.c.l.bf16 %v1104_v14  ;;  %v954_v27 = vunpack.c.h.bf16 %v1104_v14 }
  0x2b   :  { %v238_v28 = vrot.slane %v237_v20, 4  ;;  %v245_v29 = vrot.slane %v244_v21, 4  ;;  %v957_v30 = vunpack.c.l.bf16 %v1105_v19  ;;  %v958_v31 = vunpack.c.h.bf16 %v1105_v19 }
  0x2c   :  { %v225_v32 = vadd.f32 %v224_v24, %v223_v15  ;;  %v232_v33 = vadd.f32 %v231_v25, %v230_v16  ;;  %v167_v34 = vadd.f32 %v946_v18, %v945_v17  ;;  %v174_v35 = vadd.f32 %v950_v23, %v949_v22  ;;  %v1119_v17 = vld [vmem:[#allocation2 + $0x88] sm:$0xff]  }
  0x2d   :  { %v239_v36 = vadd.f32 %v238_v28, %v237_v20  ;;  %v246_v37 = vadd.f32 %v245_v29, %v244_v21  ;;  %v181_v38 = vadd.f32 %v954_v27, %v953_v26  ;;  %v188_v39 = vadd.f32 %v958_v31, %v957_v30  ;;  %v1120_v26 = vld [vmem:[#allocation2 + $0x90] sm:$0xff]   ;;  %v1121_v27 = vld [vmem:[#allocation2 + $0x98] sm:$0xff]  }
  0x2e   :  { %v226_v40 = vrot.slane %v225_v32, 2  ;;  %v233_v41 = vrot.slane %v232_v33, 2  ;;  %v168_v42 = vrot.slane %v167_v34, 4  ;;  %v175_v43 = vrot.slane %v174_v35, 4 }
  0x2f   :  { %v240_v44 = vrot.slane %v239_v36, 2  ;;  %v247_v45 = vrot.slane %v246_v37, 2  ;;  %vm550_vm2 = vcmask 1043459   ;;  %v182_v46 = vrot.slane %v181_v38, 4 }
  0x30   :  { %v189_v47 = vrot.slane %v188_v39, 4  ;;  %v227_v48 = vadd.f32 %v226_v40, %v225_v32  ;;  %v234_v49 = vadd.f32 %v233_v41, %v232_v33  ;;  %vm602_vm3 = vcmask 1043456  }
  0x31   :  { %v169_v50 = vadd.f32 %v168_v42, %v167_v34  ;;  %v176_v51 = vadd.f32 %v175_v43, %v174_v35  ;;  %v241_v52 = vadd.f32 %v240_v44, %v239_v36  ;;  %v248_v53 = vadd.f32 %v247_v45, %v246_v37  ;;  %v1106_v36 = vld [vmem:[#allocation2 + $0x20] sm:$0xff]   ;;  %v1107_v45 = vld [vmem:[#allocation2 + $0x28] sm:$0xff]  }
  0x32   :  { %v183_v54 = vadd.f32 %v182_v46, %v181_v38  ;;  %v190_v55 = vadd.f32 %v189_v47, %v188_v39  ;;  %v228_v56 = vrot.slane %v227_v48, 1  ;;  %v235_v57 = vrot.slane %v234_v49, 1  ;;  %v1108_v46 = vld [vmem:[#allocation2 + $0x30] sm:$0xff]  }
  0x33   :  { %v170_v58 = vrot.slane %v169_v50, 2  ;;  %v177_v59 = vrot.slane %v176_v51, 2  ;;  %v242_v60 = vrot.slane %v241_v52, 1  ;;  %v249_v61 = vrot.slane %v248_v53, 1 }
  0x34   :  { %v184_v62 = vrot.slane %v183_v54, 2  ;;  %v191_v63 = vrot.slane %v190_v55, 2  ;;  %v1258_v0 = vadd.f32 %v228_v56, %v227_v48  ;;  %v1260_v1 = vadd.f32 %v235_v57, %v234_v49 }
  0x35   :  { %v171_v2 = vadd.f32 %v170_v58, %v169_v50  ;;  %v178_v3 = vadd.f32 %v177_v59, %v176_v51  ;;  %v1262_v4 = vadd.f32 %v242_v60, %v241_v52  ;;  %v1264_v5 = vadd.f32 %v249_v61, %v248_v53 }
  0x36   :  { %v185_v6 = vadd.f32 %v184_v62, %v183_v54  ;;  %v192_v7 = vadd.f32 %v191_v63, %v190_v55  ;;  %v635_v9 = vmul.f32 %v1258_v0, %v1258_v0  ;;  %v636_v10 = vmul.f32 %v1260_v1, %v1260_v1  ;;  %v1109_v55 = vld [vmem:[#allocation2 + $0x38] sm:$0xff]  }
  0x37   :  { %v172_v11 = vrot.slane %v171_v2, 1  ;;  %v179_v12 = vrot.slane %v178_v3, 1  ;;  %v637_v13 = vmul.f32 %v1262_v4, %v1262_v4  ;;  %v638_v14 = vmul.f32 %v1264_v5, %v1264_v5 }
  0x38   :  { %v186_v15 = vrot.slane %v185_v6, 1  ;;  %v193_v16 = vrot.slane %v192_v7, 1  ;;  %v697_v18 = vsel %vm544_vm0, %v636_v10, %v635_v9  ;;  %v1009_v21 = vunpack.c.l.bf16 %v1118_v8 }
  0x39   :  { %v1275_v19 = vadd.f32 %v172_v11, %v171_v2  ;;  %v1277_v20 = vadd.f32 %v179_v12, %v178_v3  ;;  %v698_v22 = vsel %vm547_vm1, %v637_v13, %v697_v18  ;;  %v1010_v25 = vunpack.c.h.bf16 %v1118_v8 }
  0x3a   :  { %v1280_v23 = vadd.f32 %v186_v15, %v185_v6  ;;  %v1282_v24 = vadd.f32 %v193_v16, %v192_v7  ;;  %v699_v28 = vsel %vm550_vm2, %v638_v14, %v698_v22  ;;  %v1013_v31 = vunpack.c.l.bf16 %v1119_v17 }
  0x3b   :  { %v627_v29 = vmul.f32 %v1275_v19, %v1275_v19  ;;  %v628_v30 = vmul.f32 %v1277_v20, %v1277_v20  ;;  %v729_v32 = vsel %vm602_vm3, %v699_v28, 0.0  ;;  %v1014_v35 = vunpack.c.h.bf16 %v1119_v17 }
  0x3c   :  { %v629_v33 = vmul.f32 %v1280_v23, %v1280_v23  ;;  %v630_v34 = vmul.f32 %v1282_v24, %v1282_v24  ;;  %730 = vadd.xlane.f32.xlu1 %v729_v32  ;;  %v1017_v38 = vunpack.c.l.bf16 %v1120_v26  ;;  %v1018_v39 = vunpack.c.h.bf16 %v1120_v26 }
  0x3d   :  { %v691_v37 = vsel %vm544_vm0, %v628_v30, %v627_v29  ;;  %v1021_v40 = vunpack.c.l.bf16 %v1121_v27  ;;  %v1022_v42 = vunpack.c.h.bf16 %v1121_v27  ;;  %v279_v43 = vadd.f32 %v1010_v25, %v1009_v21 }
  0x3e   :  { %v692_v41 = vsel %vm547_vm1, %v629_v33, %v691_v37  ;;  %v286_v44 = vadd.f32 %v1014_v35, %v1013_v31  ;;  %v293_v48 = vadd.f32 %v1018_v39, %v1017_v38  ;;  %v961_v49 = vunpack.c.l.bf16 %v1106_v36 }
  0x3f   :  { %v693_v47 = vsel %vm550_vm2, %v630_v34, %v692_v41  ;;  %v962_v50 = vunpack.c.h.bf16 %v1106_v36  ;;  %v280_v52 = vrot.slane %v279_v43, 4  ;;  %v300_v54 = vadd.f32 %v1022_v42, %v1021_v40 }
  0x40   :  { %v723_v51 = vsel %vm602_vm3, %v693_v47, 0.0  ;;  %v287_v53 = vrot.slane %v286_v44, 4  ;;  %v294_v56 = vrot.slane %v293_v48, 4  ;;  %v965_v57 = vunpack.c.l.bf16 %v1107_v45 }
  0x41   :  { %724 = vadd.xlane.f32.xlu0 %v723_v51  ;;  %v966_v58 = vunpack.c.h.bf16 %v1107_v45  ;;  %v969_v59 = vunpack.c.l.bf16 %v1108_v46  ;;  %v281_v60 = vadd.f32 %v280_v52, %v279_v43  ;;  %v301_v62 = vrot.slane %v300_v54, 4 }
  0x42   :  { %v288_v61 = vadd.f32 %v287_v53, %v286_v44  ;;  %v970_v63 = vunpack.c.h.bf16 %v1108_v46  ;;  %v295_v2 = vadd.f32 %v294_v56, %v293_v48  ;;  %v973_v3 = vunpack.c.l.bf16 %v1109_v55  ;;  %v1072_v44 = vld [vmem:[#allocation4] sm:$0xff]   ;;  %v1134_v53 = vld [vmem:[#allocation4 + $0x8] sm:$0xff]  }
  0x43   :  { %v974_v6 = vunpack.c.h.bf16 %v1109_v55  ;;  %v195_v7 = vadd.f32 %v962_v50, %v961_v49  ;;  %v282_v8 = vrot.slane %v281_v60, 2  ;;  %v302_v10 = vadd.f32 %v301_v62, %v300_v54  ;;  %v1135_v62 = vld [vmem:[#allocation4 + $0x10] sm:$0xff]  }
  0x44   :  { %v289_v9 = vrot.slane %v288_v61, 2  ;;  %v202_v11 = vadd.f32 %v966_v58, %v965_v57  ;;  %v296_v12 = vrot.slane %v295_v2, 2  ;;  %v209_v14 = vadd.f32 %v970_v63, %v969_v59 }
  0x45   :  { %v196_v13 = vrot.slane %v195_v7, 4  ;;  %v216_v15 = vadd.f32 %v974_v6, %v973_v3  ;;  %v283_v16 = vadd.f32 %v282_v8, %v281_v60  ;;  %v303_v18 = vrot.slane %v302_v10, 2 }
  0x46   :  { %v290_v17 = vadd.f32 %v289_v9, %v288_v61  ;;  %v203_v21 = vrot.slane %v202_v11, 4  ;;  %v297_v22 = vadd.f32 %v296_v12, %v295_v2  ;;  %v210_v26 = vrot.slane %v209_v14, 4  ;;  %v1137_v12 = vld [vmem:[#allocation4 + $0x20] sm:$0xff]  }
  0x47   :  { %v197_v25 = vadd.f32 %v196_v13, %v195_v7  ;;  %v217_v27 = vrot.slane %v216_v15, 4  ;;  %v284_v28 = vrot.slane %v283_v16, 1  ;;  %v304_v30 = vadd.f32 %v303_v18, %v302_v10  ;;  %v1136_v7 = vld [vmem:[#allocation4 + $0x18] sm:$0xff]   ;;  %v1138_v13 = vld [vmem:[#allocation4 + $0x28] sm:$0xff]   ;;  %v1139_v18 = vld [vmem:[#allocation4 + $0x30] sm:$0xff]  }
  0x48   :  { %v291_v29 = vrot.slane %v290_v17, 1  ;;  %v204_v31 = vadd.f32 %v203_v21, %v202_v11  ;;  %v298_v32 = vrot.slane %v297_v22, 1  ;;  %v211_v34 = vadd.f32 %v210_v26, %v209_v14 }
  0x49   :  { %v198_v33 = vrot.slane %v197_v25, 2  ;;  %v218_v35 = vadd.f32 %v217_v27, %v216_v15  ;;  %v1298_v36 = vadd.f32 %v284_v28, %v283_v16  ;;  %v305_v38 = vrot.slane %v304_v30, 1  ;;  %v1140_v27 = vld [vmem:[#allocation4 + $0x38] sm:$0xff]  }
  0x4a   :  { %v1300_v37 = vadd.f32 %v291_v29, %v290_v17  ;;  %v205_v39 = vrot.slane %v204_v31, 2  ;;  %v1302_v40 = vadd.f32 %v298_v32, %v297_v22  ;;  %v212_v42 = vrot.slane %v211_v34, 2 }
  0x4b   :  { %v199_v41 = vadd.f32 %v198_v33, %v197_v25  ;;  %v219_v43 = vrot.slane %v218_v35, 2  ;;  %v1304_v45 = vadd.f32 %v305_v38, %v304_v30  ;;  %v643_v46 = vmul.f32 %v1298_v36, %v1298_v36 }
  0x4c   :  { %v644_v47 = vmul.f32 %v1300_v37, %v1300_v37  ;;  %v206_v48 = vadd.f32 %v205_v39, %v204_v31  ;;  %v645_v49 = vmul.f32 %v1302_v40, %v1302_v40  ;;  %v213_v51 = vadd.f32 %v212_v42, %v211_v34 }
  0x4d   :  { %v200_v50 = vrot.slane %v199_v41, 1  ;;  %v220_v52 = vadd.f32 %v219_v43, %v218_v35  ;;  %v646_v54 = vmul.f32 %v1304_v45, %v1304_v45  ;;  %v1073_v57 = vunpack.c.l.bf16 %v1072_v44 }
  0x4e   :  { %v703_v55 = vsel %vm544_vm0, %v644_v47, %v643_v46  ;;  %v207_v56 = vrot.slane %v206_v48, 1  ;;  %v214_v60 = vrot.slane %v213_v51, 1  ;;  %v1074_v3 = vunpack.c.h.bf16 %v1072_v44 }
  0x4f   :  { %v704_v58 = vsel %vm547_vm1, %v645_v49, %v703_v55  ;;  %v1316_v59 = vadd.f32 %v200_v50, %v199_v41  ;;  %v221_v61 = vrot.slane %v220_v52, 1  ;;  %v1077_v6 = vunpack.c.l.bf16 %v1134_v53 }
  0x50   :  { %v705_v63 = vsel %vm550_vm2, %v646_v54, %v704_v58  ;;  %v1319_v2 = vadd.f32 %v207_v56, %v206_v48  ;;  %v1322_v9 = vadd.f32 %v214_v60, %v213_v51  ;;  %v1078_v15 = vunpack.c.h.bf16 %v1134_v53 }
  0x51   :  { %v735_v8 = vsel %vm602_vm3, %v705_v63, 0.0  ;;  %v1324_v10 = vadd.f32 %v221_v61, %v220_v52  ;;  %v631_v11 = vmul.f32 %v1316_v59, %v1316_v59  ;;  %v1081_v16 = vunpack.c.l.bf16 %v1135_v62 }
  0x52   :  { %736 = vadd.xlane.f32.xlu1 %v735_v8  ;;  %v632_v14 = vmul.f32 %v1319_v2, %v1319_v2  ;;  %v1082_v17 = vunpack.c.h.bf16 %v1135_v62  ;;  %v633_v21 = vmul.f32 %v1322_v9, %v1322_v9  ;;  %v1085_v25 = vunpack.c.l.bf16 %v1136_v7 }
  0x53   :  { %v634_v22 = vmul.f32 %v1324_v10, %v1324_v10  ;;  %v1086_v26 = vunpack.c.h.bf16 %v1136_v7  ;;  %v1089_v29 = vunpack.c.l.bf16 %v1137_v12  ;;  %v1090_v30 = vunpack.c.h.bf16 %v1137_v12 }
  0x54   :  { %v694_v28 = vsel %vm544_vm0, %v632_v14, %v631_v11  ;;  %v1093_v31 = vunpack.c.l.bf16 %v1138_v13  ;;  %v1094_v33 = vunpack.c.h.bf16 %v1138_v13  ;;  %v1097_v34 = vunpack.c.l.bf16 %v1139_v18 }
  0x55   :  { %v695_v32 = vsel %vm547_vm1, %v633_v21, %v694_v28  ;;  %v1098_v35 = vunpack.c.h.bf16 %v1139_v18  ;;  %v1101_v39 = vunpack.c.l.bf16 %v1140_v27  ;;  %v1102_v41 = vunpack.c.h.bf16 %v1140_v27 }
  0x56   :  { %v696_v38 = vsel %vm550_vm2, %v634_v22, %v695_v32  ;;  %v423_v42 = vadd.f32 %v1074_v3, %v1073_v57  ;;  %v430_v44 = vadd.f32 %v1078_v15, %v1077_v6  ;;  %v437_v46 = vadd.f32 %v1082_v17, %v1081_v16 }
  0x57   :  { %v726_v43 = vsel %vm602_vm3, %v696_v38, 0.0  ;;  %v444_v47 = vadd.f32 %v1086_v26, %v1085_v25  ;;  %v451_v49 = vadd.f32 %v1090_v30, %v1089_v29  ;;  %v458_v50 = vadd.f32 %v1094_v33, %v1093_v31 }
  0x58   :  { %727 = vadd.xlane.f32.xlu0 %v726_v43  ;;  %v424_v48 = vrot.slane %v423_v42, 4  ;;  %v465_v51 = vadd.f32 %v1098_v35, %v1097_v34  ;;  %v431_v52 = vrot.slane %v430_v44, 4  ;;  %v438_v53 = vrot.slane %v437_v46, 4 }
  0x59   :  { %v445_v54 = vrot.slane %v444_v47, 4  ;;  %v472_v55 = vadd.f32 %v1102_v41, %v1101_v39  ;;  %v452_v58 = vrot.slane %v451_v49, 4  ;;  %v459_v60 = vrot.slane %v458_v50, 4 }
  0x5a   :  { %v425_v56 = vadd.f32 %v424_v48, %v423_v42  ;;  %v466_v61 = vrot.slane %v465_v51, 4  ;;  %v432_v62 = vadd.f32 %v431_v52, %v430_v44  ;;  %v439_v57 = vadd.f32 %v438_v53, %v437_v46  ;;  %v1114_v48 = vld [vmem:[#allocation2 + $0x60] sm:$0xff]   ;;  %v1115_v53 = vld [vmem:[#allocation2 + $0x68] sm:$0xff]  }
  0x5b   :  { %v446_v63 = vadd.f32 %v445_v54, %v444_v47  ;;  %v473_v3 = vrot.slane %v472_v55, 4  ;;  %v453_v7 = vadd.f32 %v452_v58, %v451_v49  ;;  %v460_v8 = vadd.f32 %v459_v60, %v458_v50  ;;  %v1116_v60 = vld [vmem:[#allocation2 + $0x70] sm:$0xff]  }
  0x5c   :  { %v426_v6 = vrot.slane %v425_v56, 2  ;;  %v467_v11 = vadd.f32 %v466_v61, %v465_v51  ;;  %v433_v12 = vrot.slane %v432_v62, 2  ;;  %v440_v13 = vrot.slane %v439_v57, 2 }
  0x5d   :  { %v447_v14 = vrot.slane %v446_v63, 2  ;;  %v474_v15 = vadd.f32 %v473_v3, %v472_v55  ;;  %v454_v17 = vrot.slane %v453_v7, 2  ;;  %v461_v18 = vrot.slane %v460_v8, 2  ;;  %v1117_v3 = vld [vmem:[#allocation2 + $0x78] sm:$0xff]  }
  0x5e   :  { %v427_v16 = vadd.f32 %v426_v6, %v425_v56  ;;  %v468_v21 = vrot.slane %v467_v11, 2  ;;  %v434_v22 = vadd.f32 %v433_v12, %v432_v62  ;;  %v441_v25 = vadd.f32 %v440_v13, %v439_v57  ;;  %v1126_v12 = vld [vmem:[#allocation2 + $0xc0] sm:$0xff]  }
  0x5f   :  { %v448_v26 = vadd.f32 %v447_v14, %v446_v63  ;;  %v475_v27 = vrot.slane %v474_v15, 2  ;;  %vm766_vm4 = vcmask 1044484   ;;  %v455_v29 = vadd.f32 %v454_v17, %v453_v7 }
  0x60   :  { %v428_v28 = vrot.slane %v427_v16, 1  ;;  %v462_v30 = vadd.f32 %v461_v18, %v460_v8  ;;  %v469_v31 = vadd.f32 %v468_v21, %v467_v11  ;;  %vm768_vm5 = vcmask 1045509  }
  0x61   :  { %v435_v32 = vrot.slane %v434_v22, 1  ;;  %v442_v33 = vrot.slane %v441_v25, 1  ;;  %v449_v34 = vrot.slane %v448_v26, 1  ;;  %v476_v35 = vadd.f32 %v475_v27, %v474_v15 }
  0x62   :  { %vm770_vm6 = vcmask 1046534   ;;  %v1338_v38 = vadd.f32 %v428_v28, %v427_v16  ;;  %v456_v39 = vrot.slane %v455_v29, 1  ;;  %v463_v41 = vrot.slane %v462_v30, 1 }
  0x63   :  { %v470_v42 = vrot.slane %v469_v31, 1  ;;  %vm772_vm7 = vcmask 1047559   ;;  %v1340_v43 = vadd.f32 %v435_v32, %v434_v22  ;;  %v1342_v44 = vadd.f32 %v442_v33, %v441_v25  ;;  %v1127_v25 = vld [vmem:[#allocation2 + $0xc8] sm:$0xff]  }
  0x64   :  { %v1344_v46 = vadd.f32 %v449_v34, %v448_v26  ;;  %v477_v47 = vrot.slane %v476_v35, 1  ;;  %v1346_v49 = vadd.f32 %v456_v39, %v455_v29  ;;  %v1348_v50 = vadd.f32 %v463_v41, %v462_v30  ;;  %v1128_v34 = vld [vmem:[#allocation2 + $0xd0] sm:$0xff]  }
  0x65   :  { %v1350_v51 = vadd.f32 %v470_v42, %v469_v31  ;;  %v747_v52 = vmul.f32 %v1338_v38, %v1338_v38  ;;  %v748_v55 = vmul.f32 %v1340_v43, %v1340_v43  ;;  %v749_v56 = vmul.f32 %v1342_v44, %v1342_v44 }
  0x66   :  { %v1354_v54 = vadd.f32 %v477_v47, %v476_v35  ;;  %v750_v58 = vmul.f32 %v1344_v46, %v1344_v46  ;;  %v751_v61 = vmul.f32 %v1346_v49, %v1346_v49  ;;  %v752_v62 = vmul.f32 %v1348_v50, %v1348_v50  ;;  %v1129_v47 = vld [vmem:[#allocation2 + $0xd8] sm:$0xff]  }
  0x67   :  { %v753_v57 = vmul.f32 %v1350_v51, %v1350_v51  ;;  %v993_v63 = vunpack.c.l.bf16 %v1114_v48  ;;  %v763_v7 = vsel %vm544_vm0, %v748_v55, %v747_v52  ;;  %v994_v8 = vunpack.c.h.bf16 %v1114_v48 }
  0x68   :  { %1608 = vst [vmem:[#allocation8_spill] sm:$0xff] %v1354_v54  ;;  %v754_v6 = vmul.f32 %v1354_v54, %v1354_v54  ;;  %v997_v11 = vunpack.c.l.bf16 %v1115_v53  ;;  %v764_v13 = vsel %vm547_vm1, %v749_v56, %v763_v7  ;;  %v998_v14 = vunpack.c.h.bf16 %v1115_v53 }
  0x69   :  { %v1001_v15 = vunpack.c.l.bf16 %v1116_v60  ;;  %v1002_v16 = vunpack.c.h.bf16 %v1116_v60  ;;  %v765_v17 = vsel %vm550_vm2, %v750_v58, %v764_v13  ;;  %v1005_v18 = vunpack.c.l.bf16 %v1117_v3 }
  0x6a   :  { %v1006_v21 = vunpack.c.h.bf16 %v1117_v3  ;;  %v251_v22 = vadd.f32 %v994_v8, %v993_v63  ;;  %v767_v26 = vsel %vm766_vm4, %v751_v61, %v765_v17  ;;  %v258_v27 = vadd.f32 %v998_v14, %v997_v11 }
  0x6b   :  { %v265_v28 = vadd.f32 %v1002_v16, %v1001_v15  ;;  %v1041_v29 = vunpack.c.l.bf16 %v1126_v12  ;;  %v769_v30 = vsel %vm768_vm5, %v752_v62, %v767_v26  ;;  %v1042_v33 = vunpack.c.h.bf16 %v1126_v12 }
  0x6c   :  { %v252_v31 = vrot.slane %v251_v22, 4  ;;  %v272_v32 = vadd.f32 %v1006_v21, %v1005_v18  ;;  %v771_v35 = vsel %vm770_vm6, %v753_v57, %v769_v30  ;;  %v259_v39 = vrot.slane %v258_v27, 4 }
  0x6d   :  { %v266_v41 = vrot.slane %v265_v28, 4  ;;  %v1045_v42 = vunpack.c.l.bf16 %v1127_v25  ;;  %v773_v48 = vsel %vm772_vm7, %v754_v6, %v771_v35  ;;  %v1046_v55 = vunpack.c.h.bf16 %v1127_v25 }
  0x6e   :  { %v253_v52 = vadd.f32 %v252_v31, %v251_v22  ;;  %v273_v53 = vrot.slane %v272_v32, 4  ;;  %775 = vadd.xlane.f32.xlu1 %v773_v48  ;;  %v260_v56 = vadd.f32 %v259_v39, %v258_v27  ;;  %v1049_v60 = vunpack.c.l.bf16 %v1128_v34  ;;  %v1122_v48 = vld [vmem:[#allocation2 + $0xa0] sm:$0xff]  }
  0x6f   :  { %v267_v58 = vadd.f32 %v266_v41, %v265_v28  ;;  %v1050_v61 = vunpack.c.h.bf16 %v1128_v34  ;;  %v1053_v3 = vunpack.c.l.bf16 %v1129_v47  ;;  %v1054_v7 = vunpack.c.h.bf16 %v1129_v47 }
  0x70   :  { %v254_v62 = vrot.slane %v253_v52, 2  ;;  %v274_v63 = vadd.f32 %v273_v53, %v272_v32  ;;  %v261_v8 = vrot.slane %v260_v56, 2  ;;  %v335_v11 = vadd.f32 %v1042_v33, %v1041_v29 }
  0x71   :  { %v268_v57 = vrot.slane %v267_v58, 2  ;;  %v342_v12 = vadd.f32 %v1046_v55, %v1045_v42  ;;  %v349_v15 = vadd.f32 %v1050_v61, %v1049_v60  ;;  %v356_v6 = vadd.f32 %v1054_v7, %v1053_v3 }
  0x72   :  { %v255_v13 = vadd.f32 %v254_v62, %v253_v52  ;;  %v275_v14 = vrot.slane %v274_v63, 2  ;;  %v262_v16 = vadd.f32 %v261_v8, %v260_v56  ;;  %v336_v18 = vrot.slane %v335_v11, 4 }
  0x73   :  { %v269_v17 = vadd.f32 %v268_v57, %v267_v58  ;;  %v343_v21 = vrot.slane %v342_v12, 4  ;;  %v350_v26 = vrot.slane %v349_v15, 4  ;;  %v357_v27 = vrot.slane %v356_v6, 4 }
  0x74   :  { %v256_v22 = vrot.slane %v255_v13, 1  ;;  %v276_v25 = vadd.f32 %v275_v14, %v274_v63  ;;  %v263_v28 = vrot.slane %v262_v16, 1  ;;  %v337_v31 = vadd.f32 %v336_v18, %v335_v11  ;;  %v1123_v63 = vld [vmem:[#allocation2 + $0xa8] sm:$0xff]  }
  0x75   :  { %v270_v30 = vrot.slane %v269_v17, 1  ;;  %v344_v32 = vadd.f32 %v343_v21, %v342_v12  ;;  %v351_v33 = vadd.f32 %v350_v26, %v349_v15  ;;  %v358_v35 = vadd.f32 %v357_v27, %v356_v6  ;;  %v1124_v15 = vld [vmem:[#allocation2 + $0xb0] sm:$0xff]   ;;  %v1125_v21 = vld [vmem:[#allocation2 + $0xb8] sm:$0xff]  }
  0x76   :  { %v1377_v34 = vadd.f32 %v256_v22, %v255_v13  ;;  %v277_v29 = vrot.slane %v276_v25, 1  ;;  %v1379_v39 = vadd.f32 %v263_v28, %v262_v16  ;;  %v338_v42 = vrot.slane %v337_v31, 2 }
  0x77   :  { %v1381_v41 = vadd.f32 %v270_v30, %v269_v17  ;;  %v345_v47 = vrot.slane %v344_v32, 2  ;;  %v352_v55 = vrot.slane %v351_v33, 2  ;;  %v359_v56 = vrot.slane %v358_v35, 2 }
  0x78   :  { %v1383_v52 = vadd.f32 %v277_v29, %v276_v25  ;;  %v639_v53 = vmul.f32 %v1377_v34, %v1377_v34  ;;  %v640_v58 = vmul.f32 %v1379_v39, %v1379_v39  ;;  %v339_v61 = vadd.f32 %v338_v42, %v337_v31  ;;  %v1130_v29 = vld [vmem:[#allocation2 + $0xe0] sm:$0xff]  }
  0x79   :  { %v641_v60 = vmul.f32 %v1381_v41, %v1381_v41  ;;  %v346_v62 = vadd.f32 %v345_v47, %v344_v32  ;;  %v353_v7 = vadd.f32 %v352_v55, %v351_v33  ;;  %v360_v8 = vadd.f32 %v359_v56, %v358_v35 }
  0x7a   :  { %v642_v3 = vmul.f32 %v1383_v52, %v1383_v52  ;;  %v1025_v57 = vunpack.c.l.bf16 %v1122_v48  ;;  %v700_v11 = vsel %vm544_vm0, %v640_v58, %v639_v53  ;;  %v340_v12 = vrot.slane %v339_v61, 1  ;;  %v1131_v58 = vld [vmem:[#allocation2 + $0xe8] sm:$0xff]  }
  0x7b   :  { %v347_v13 = vrot.slane %v346_v62, 1  ;;  %v1026_v14 = vunpack.c.h.bf16 %v1122_v48  ;;  %v701_v6 = vsel %vm547_vm1, %v641_v60, %v700_v11  ;;  %v354_v16 = vrot.slane %v353_v7, 1 }
  0x7c   :  { %v361_v17 = vrot.slane %v360_v8, 1  ;;  %v1029_v18 = vunpack.c.l.bf16 %v1123_v63  ;;  %v702_v22 = vsel %vm550_vm2, %v642_v3, %v701_v6  ;;  %v1396_v25 = vadd.f32 %v340_v12, %v339_v61  ;;  %v1132_v12 = vld [vmem:[#allocation2 + $0xf0] sm:$0xff]  }
  0x7d   :  { %v1398_v26 = vadd.f32 %v347_v13, %v346_v62  ;;  %v1030_v27 = vunpack.c.h.bf16 %v1123_v63  ;;  %v732_v28 = vsel %vm602_vm3, %v702_v22, 0.0  ;;  %v1401_v30 = vadd.f32 %v354_v16, %v353_v7 }
  0x7e   :  { %v1403_v31 = vadd.f32 %v361_v17, %v360_v8  ;;  %v1033_v32 = vunpack.c.l.bf16 %v1124_v15  ;;  %733 = vadd.xlane.f32.xlu0 %v732_v28  ;;  %v651_v33 = vmul.f32 %v1396_v25, %v1396_v25  ;;  %v1034_v42 = vunpack.c.h.bf16 %v1124_v15  ;;  %v1133_v17 = vld [vmem:[#allocation2 + $0xf8] sm:$0xff]  }
  0x7f   :  { %v652_v35 = vmul.f32 %v1398_v26, %v1398_v26  ;;  %v1037_v47 = vunpack.c.l.bf16 %v1125_v21  ;;  %v653_v48 = vmul.f32 %v1401_v30, %v1401_v30  ;;  %v1038_v55 = vunpack.c.h.bf16 %v1125_v21 }
  0x80   :  { %1609 = vst [vmem:[#allocation9_spill] sm:$0xff] %v1403_v31  ;;  %v654_v53 = vmul.f32 %v1403_v31, %v1403_v31  ;;  %v307_v56 = vadd.f32 %v1026_v14, %v1025_v57  ;;  %v314_v61 = vadd.f32 %v1030_v27, %v1029_v18  ;;  %v321_v62 = vadd.f32 %v1034_v42, %v1033_v32 }
  0x81   :  { %v709_v60 = vsel %vm544_vm0, %v652_v35, %v651_v33  ;;  %v1057_v63 = vunpack.c.l.bf16 %v1130_v29  ;;  %v328_v8 = vadd.f32 %v1038_v55, %v1037_v47  ;;  %v1058_v11 = vunpack.c.h.bf16 %v1130_v29 }
  0x82   :  { %v710_v3 = vsel %vm547_vm1, %v653_v48, %v709_v60  ;;  %v308_v7 = vrot.slane %v307_v56, 4  ;;  %v315_v15 = vrot.slane %v314_v61, 4  ;;  %v322_v6 = vrot.slane %v321_v62, 4 }
  0x83   :  { %v711_v13 = vsel %vm550_vm2, %v654_v53, %v710_v3  ;;  %v1061_v16 = vunpack.c.l.bf16 %v1131_v58  ;;  %v329_v21 = vrot.slane %v328_v8, 4  ;;  %v1062_v22 = vunpack.c.h.bf16 %v1131_v58 }
  0x84   :  { %v741_v57 = vsel %vm602_vm3, %v711_v13, 0.0  ;;  %v309_v14 = vadd.f32 %v308_v7, %v307_v56  ;;  %v316_v18 = vadd.f32 %v315_v15, %v314_v61  ;;  %v323_v27 = vadd.f32 %v322_v6, %v321_v62 }
  0x85   :  { %742 = vadd.xlane.f32.xlu1 %v741_v57  ;;  %v1065_v28 = vunpack.c.l.bf16 %v1132_v12  ;;  %v1066_v32 = vunpack.c.h.bf16 %v1132_v12  ;;  %v330_v35 = vadd.f32 %v329_v21, %v328_v8  ;;  %v1069_v29 = vunpack.c.l.bf16 %v1133_v17 }
  0x86   :  { %v310_v33 = vrot.slane %v309_v14, 2  ;;  %v1070_v42 = vunpack.c.h.bf16 %v1133_v17  ;;  %v317_v47 = vrot.slane %v316_v18, 2  ;;  %v324_v48 = vrot.slane %v323_v27, 2 }
  0x87   :  { %v363_v53 = vadd.f32 %v1058_v11, %v1057_v63  ;;  %v370_v55 = vadd.f32 %v1062_v22, %v1061_v16  ;;  %v331_v3 = vrot.slane %v330_v35, 2  ;;  %v377_v54 = vadd.f32 %v1066_v32, %v1065_v28 }
  0x88   :  { %v311_v60 = vadd.f32 %v310_v33, %v309_v14  ;;  %v384_v13 = vadd.f32 %v1070_v42, %v1069_v29  ;;  %v318_v56 = vadd.f32 %v317_v47, %v316_v18  ;;  %v325_v7 = vadd.f32 %v324_v48, %v323_v27 }
  0x89   :  { %v364_v58 = vrot.slane %v363_v53, 4  ;;  %v371_v57 = vrot.slane %v370_v55, 4  ;;  %v332_v62 = vadd.f32 %v331_v3, %v330_v35  ;;  %v378_v15 = vrot.slane %v377_v54, 4 }
  0x8a   :  { %v312_v61 = vrot.slane %v311_v60, 1  ;;  %v385_v12 = vrot.slane %v384_v13, 4  ;;  %v319_v6 = vrot.slane %v318_v56, 1  ;;  %v326_v8 = vrot.slane %v325_v7, 1 }
  0x8b   :  { %v365_v21 = vadd.f32 %v364_v58, %v363_v53  ;;  %v372_v17 = vadd.f32 %v371_v57, %v370_v55  ;;  %v333_v63 = vrot.slane %v332_v62, 1  ;;  %v379_v11 = vadd.f32 %v378_v15, %v377_v54 }
  0x8c   :  { %v1417_v31 = vadd.f32 %v312_v61, %v311_v60  ;;  %v386_v16 = vadd.f32 %v385_v12, %v384_v13  ;;  %v1419_v14 = vadd.f32 %v319_v6, %v318_v56  ;;  %v1421_v22 = vadd.f32 %v326_v8, %v325_v7 }
  0x8d   :  { %v366_v18 = vrot.slane %v365_v21, 2  ;;  %v373_v27 = vrot.slane %v372_v17, 2  ;;  %v1423_v28 = vadd.f32 %v333_v63, %v332_v62  ;;  %v380_v33 = vrot.slane %v379_v11, 2 }
  0x8e   :  { %v647_v32 = vmul.f32 %v1417_v31, %v1417_v31  ;;  %v387_v35 = vrot.slane %v386_v16, 2  ;;  %v648_v29 = vmul.f32 %v1419_v14, %v1419_v14  ;;  %v649_v54 = vmul.f32 %v1421_v22, %v1421_v22 }
  0x8f   :  { %v367_v42 = vadd.f32 %v366_v18, %v365_v21  ;;  %v374_v47 = vadd.f32 %v373_v27, %v372_v17  ;;  %v650_v48 = vmul.f32 %v1423_v28, %v1423_v28  ;;  %v381_v53 = vadd.f32 %v380_v33, %v379_v11 }
  0x90   :  { %v388_v55 = vadd.f32 %v387_v35, %v386_v16  ;;  %v479_v60 = vmul.f32 %v1338_v38, %v1275_v19  ;;  %v706_v3 = vsel %vm544_vm0, %v648_v29, %v647_v32  ;;  %v480_v7 = vmul.f32 %v1338_v38, %v1277_v20 }
  0x91   :  { %v368_v13 = vrot.slane %v367_v42, 1  ;;  %v375_v56 = vrot.slane %v374_v47, 1  ;;  %v707_v58 = vsel %vm547_vm1, %v649_v54, %v706_v3  ;;  %v382_v57 = vrot.slane %v381_v53, 1 }
  0x92   :  { %v389_v61 = vrot.slane %v388_v55, 1  ;;  %v481_v62 = vmul.f32 %v1338_v38, %v1280_v23  ;;  %v708_v15 = vsel %vm550_vm2, %v650_v48, %v707_v58  ;;  %v482_v19 = vmul.f32 %v1338_v38, %v1282_v24 }
  0x93   :  { %v1442_v12 = vadd.f32 %v368_v13, %v367_v42  ;;  %v1444_v6 = vadd.f32 %v375_v56, %v374_v47  ;;  %v738_v8 = vsel %vm602_vm3, %v708_v15, 0.0  ;;  %v1449_v21 = vadd.f32 %v382_v57, %v381_v53 }
  0x94   :  { %v1451_v20 = vadd.f32 %v389_v61, %v388_v55  ;;  %v543_v17 = vrot.slane %v480_v7, 7  ;;  %739 = vadd.xlane.f32.xlu0 %v738_v8  ;;  %v546_v11 = vrot.slane %v481_v62, 6  ;;  %v549_v16 = vrot.slane %v482_v19, 5 }
  0x95   :  { %v655_v23 = vmul.f32 %v1442_v12, %v1442_v12  ;;  %v656_v63 = vmul.f32 %v1444_v6, %v1444_v6  ;;  %v657_v18 = vmul.f32 %v1449_v21, %v1449_v21  ;;  %v483_v27 = vmul.f32 %v1340_v43, %v1316_v59 }
  0x96   :  { %v658_v24 = vmul.f32 %v1451_v20, %v1451_v20  ;;  %v545_v38 = vsel %vm544_vm0, %v543_v17, %v479_v60  ;;  %v484_v35 = vmul.f32 %v1340_v43, %v1319_v2  ;;  %v485_v29 = vmul.f32 %v1340_v43, %v1322_v9 }
  0x97   :  { %v712_v32 = vsel %vm544_vm0, %v656_v63, %v655_v23  ;;  %v548_v33 = vsel %vm547_vm1, %v546_v11, %v545_v38  ;;  %v486_v47 = vmul.f32 %v1340_v43, %v1324_v10  ;;  %v487_v59 = vmul.f32 %v1342_v44, %v1258_v0 }
  0x98   :  { %v713_v54 = vsel %vm547_vm1, %v657_v18, %v712_v32  ;;  %v551_v42 = vsel %vm550_vm2, %v549_v16, %v548_v33  ;;  %v552_v55 = vrot.slane %v484_v35, 7  ;;  %v554_v60 = vrot.slane %v485_v29, 6 }
  0x99   :  { %v714_v48 = vsel %vm550_vm2, %v658_v24, %v713_v54  ;;  %v603_v53 = vsel %vm602_vm3, %v551_v42, 0.0  ;;  %v556_v9 = vrot.slane %v486_v47, 5  ;;  %v488_v3 = vmul.f32 %v1342_v44, %v1260_v1 }
  0x9a   :  { %v744_v2 = vsel %vm602_vm3, %v714_v48, 0.0  ;;  %604 = vadd.xlane.f32.xlu1 %v603_v53  ;;  %v489_v13 = vmul.f32 %v1342_v44, %v1262_v4  ;;  %v553_v10 = vsel %vm544_vm0, %v552_v55, %v483_v27  ;;  %v490_v0 = vmul.f32 %v1342_v44, %v1264_v5  ;;  %v1611_v53 = vld [vmem:[#allocation8_spill] sm:$0xff] }
  0x9b   :  { %745 = vadd.xlane.f32.xlu0 %v744_v2  ;;  %v491_v43 = vmul.f32 %v1344_v46, %v1377_v34  ;;  %v492_v56 = vmul.f32 %v1344_v46, %v1379_v39  ;;  %v555_v7 = vsel %vm547_vm1, %v554_v60, %v553_v10  ;;  %v558_v58 = vrot.slane %v488_v3, 7 }
  0x9c   :  { %v560_v57 = vrot.slane %v489_v13, 6  ;;  %v493_v1 = vmul.f32 %v1344_v46, %v1381_v41  ;;  %v557_v4 = vsel %vm550_vm2, %v556_v9, %v555_v7  ;;  %v562_v61 = vrot.slane %v490_v0, 5 }
  0x9d   :  { %v494_v62 = vmul.f32 %v1344_v46, %v1383_v52  ;;  %v564_v5 = vrot.slane %v492_v56, 7  ;;  %v606_v44 = vsel %vm602_vm3, %v557_v4, 0.0  ;;  %v559_v34 = vsel %vm544_vm0, %v558_v58, %v487_v59 }
  0x9e   :  { %v566_v15 = vrot.slane %v493_v1, 6  ;;  %v495_v39 = vmul.f32 %v1346_v49, %v1298_v36  ;;  %v561_v19 = vsel %vm547_vm1, %v560_v57, %v559_v34  ;;  %v496_v17 = vmul.f32 %v1346_v49, %v1300_v37 }
  0x9f   :  { %607 = vadd.xlane.f32.xlu0 %v606_v44  ;;  %v565_v41 = vsel %vm544_vm0, %v564_v5, %v491_v43  ;;  %v568_v8 = vrot.slane %v494_v62, 5  ;;  %v563_v46 = vsel %vm550_vm2, %v562_v61, %v561_v19  ;;  %v497_v23 = vmul.f32 %v1346_v49, %v1302_v40 }
  0xa0   :  { %v567_v52 = vsel %vm547_vm1, %v566_v15, %v565_v41  ;;  %v498_v63 = vmul.f32 %v1346_v49, %v1304_v45  ;;  %v609_v36 = vsel %vm602_vm3, %v563_v46, 0.0  ;;  %v570_v16 = vrot.slane %v496_v17, 7 }
  0xa1   :  { %v569_v11 = vsel %vm550_vm2, %v568_v8, %v567_v52  ;;  %v499_v18 = vmul.f32 %v1348_v50, %v1417_v31  ;;  %610 = vadd.xlane.f32.xlu1 %v609_v36  ;;  %v572_v24 = vrot.slane %v497_v23, 6  ;;  %v500_v27 = vmul.f32 %v1348_v50, %v1419_v14 }
  0xa2   :  { %v612_v37 = vsel %vm602_vm3, %v569_v11, 0.0  ;;  %v574_v38 = vrot.slane %v498_v63, 5  ;;  %v571_v40 = vsel %vm544_vm0, %v570_v16, %v495_v39  ;;  %v501_v45 = vmul.f32 %v1348_v50, %v1421_v22  ;;  %v1610_v22 = vld [vmem:[#allocation9_spill] sm:$0xff] }
  0xa3   :  { %613 = vadd.xlane.f32.xlu0 %v612_v37  ;;  %v502_v49 = vmul.f32 %v1348_v50, %v1423_v28  ;;  %v503_v31 = vmul.f32 %v1350_v51, %v1396_v25  ;;  %v573_v32 = vsel %vm547_vm1, %v572_v24, %v571_v40  ;;  %v576_v33 = vrot.slane %v500_v27, 7 }
  0xa4   :  { %v504_v35 = vmul.f32 %v1350_v51, %v1398_v26  ;;  %v505_v14 = vmul.f32 %v1350_v51, %v1401_v30  ;;  %v575_v29 = vsel %vm550_vm2, %v574_v38, %v573_v32  ;;  %v578_v54 = vrot.slane %v501_v45, 6 }
  0xa5   :  { %v580_v42 = vrot.slane %v502_v49, 5  ;;  %v506_v47 = vmul.f32 %v1350_v51, %v1610_v22  ;;  %v615_v50 = vsel %vm602_vm3, %v575_v29, 0.0  ;;  %v577_v25 = vsel %vm544_vm0, %v576_v33, %v499_v18 }
  0xa6   :  { %v582_v28 = vrot.slane %v504_v35, 7  ;;  %v584_v59 = vrot.slane %v505_v14, 6  ;;  %616 = vadd.xlane.f32.xlu1 %v615_v50  ;;  %v579_v48 = vsel %vm547_vm1, %v578_v54, %v577_v25  ;;  %v507_v30 = vmul.f32 %v1611_v53, %v1442_v12 }
  0xa7   :  { %v586_v26 = vrot.slane %v506_v47, 5  ;;  %v508_v55 = vmul.f32 %v1611_v53, %v1444_v6  ;;  %v581_v60 = vsel %vm550_vm2, %v580_v42, %v579_v48  ;;  %v509_v2 = vmul.f32 %v1611_v53, %v1449_v21 }
  0xa8   :  { %v583_v51 = vsel %vm544_vm0, %v582_v28, %v503_v31  ;;  %v510_v9 = vmul.f32 %v1611_v53, %v1451_v20  ;;  %v618_v3 = vsel %vm602_vm3, %v581_v60, 0.0  ;;  %v1218_v58 = vmov 0  }
  0xa9   :  { %v585_v13 = vsel %vm547_vm1, %v584_v59, %v583_v51  ;;  %v588_v10 = vrot.slane %v508_v55, 7  ;;  %619 = vadd.xlane.f32.xlu0 %v618_v3  ;;  %v590_v0 = vrot.slane %v509_v2, 6  ;;  %1146 = vset.pattern.permute.xlu1 %v1218_v58  ;;  %v813_v57 = vlaneseq }
  0xaa   :  { %v587_v12 = vsel %vm550_vm2, %v586_v26, %v585_v13  ;;  %v592_v6 = vrot.slane %v510_v9, 5  ;;  %1147 = vset.pattern.permute.xlu0 %v1218_v58 }
  0xab   :  { %v621_v43 = vsel %vm602_vm3, %v587_v12, 0.0  ;;  %v589_v56 = vsel %vm544_vm0, %v588_v10, %v507_v30  ;;  %v1553_v1 = vshrl.u32 %v813_v57, 7  ;;  %v894_v4 = vand.u32 127, %v813_v57 }
  0xac   :  { %622 = vadd.xlane.f32.xlu1 %v621_v43  ;;  %v591_v21 = vsel %vm547_vm1, %v590_v0, %v589_v56 }
  0xad   :  { %v593_v7 = vsel %vm550_vm2, %v592_v6, %v591_v21  ;;  %v1556_v61 = vsub.s32 %v894_v4, %v1553_v1  ;;  %v815_v17 = vsub.s32 0, %v1553_v1  ;;  %v819_v11 = vsub.s32 1, %v1553_v1 }
  0xae   :  { %v624_v20 = vsel %vm602_vm3, %v593_v7, 0.0  ;;  %v823_v38 = vsub.s32 2, %v1553_v1  ;;  %v827_v42 = vsub.s32 3, %v1553_v1  ;;  %v831_v48 = vsub.s32 4, %v1553_v1 }
  0xaf   :  { %625 = vadd.xlane.f32.xlu0 %v624_v20  ;;  %v835_v9 = vsub.s32 5, %v1553_v1  ;;  %v839_v43 = vsub.s32 6, %v1553_v1  ;;  %v843_v4 = vsub.s32 7, %v1553_v1 }
  0xc9   :  { %v731_v62 = vpop.xlane.xlu1 %730 }
  0xca   :  { %vm779_vm11 = vcmp.gt.f32.partialorder %v731_v62, 0.0 }
  0xce   :  { %v725_v44 = vpop.xlane.xlu0 %724 }
  0xcf   :  { %vm777_vm9 = vcmp.gt.f32.partialorder %v725_v44, 0.0 }
  0xdf   :  { %v737_v5 = vpop.xlane.xlu1 %736 }
  0xe0   :  { %vm781_vm13 = vcmp.gt.f32.partialorder %v737_v5, 0.0 }
  0xe5   :  { %v728_v15 = vpop.xlane.xlu0 %727 }
  0xe6   :  { %vm778_vm10 = vcmp.gt.f32.partialorder %v728_v15, 0.0 }
  0xfb   :  { %v776_v34 = vpop.xlane.xlu1 %775 }
  0xfc   :  { %1148 = vrsqrt.f32 %v776_v34  ;;  %vm801_vm8 = vcmp.gt.f32.partialorder %v776_v34, 0.0 }
  0xfd   :  { %1150 = vrsqrt.f32 %v725_v44 }
  0xfe   :  { %1152 = vrsqrt.f32 %v728_v15 }
  0xff   :  { %1154 = vrsqrt.f32 %v731_v62 }
 0x106   :  { %v1149_v19 = vpop.eup %1148 }
 0x107   :  { %v1561_v46 = vsel %vm801_vm8, %v1149_v19, 0.0  ;;  %v1151_v52 = vpop.eup %1150  ;;  %vm935_vm8 = vcmask 31744  }
 0x108   :  { %v816_v23 = vrot.slane %v1561_v46, %v815_v17  ;;  %v793_v63 = vsel %vm777_vm9, %v1151_v52, 0.0  ;;  %v1153_v37 = vpop.eup %1152  ;;  %v820_v27 = vrot.slane %v1561_v46, %v819_v11  ;;  %v824_v33 = vrot.slane %v1561_v46, %v823_v38 }
 0x109   :  { %v1155_v40 = vpop.eup %1154  ;;  %v794_v45 = vsel %vm778_vm10, %v1153_v37, 0.0  ;;  %v828_v59 = vrot.slane %v1561_v46, %v827_v42  ;;  %v832_v2 = vrot.slane %v1561_v46, %v831_v48  ;;  %v836_v6 = vrot.slane %v1561_v46, %v835_v9 }
 0x10a   :  { %v795_v14 = vsel %vm779_vm11, %v1155_v40, 0.0  ;;  %v840_v57 = vrot.slane %v1561_v46, %v839_v43  ;;  %v844_v34 = vrot.slane %v1561_v46, %v843_v4 }
 0x10b   :  { %v734_v39 = vpop.xlane.xlu0 %733 }
 0x10c   :  { %1156 = vrsqrt.f32 %v734_v39  ;;  %vm780_vm12 = vcmp.gt.f32.partialorder %v734_v39, 0.0 }
 0x10d   :  { %1158 = vrsqrt.f32 %v737_v5 }
 0x112   :  { %v1558_v41 = vpop.xlane.xlu1 %742 }
 0x113   :  { %vm783_vm15 = vcmp.gt.f32.partialorder %v1558_v41, 0.0 }
 0x116   :  { %v1157_v32 = vpop.eup %1156 }
 0x117   :  { %v796_v47 = vsel %vm780_vm12, %v1157_v32, 0.0  ;;  %v1159_v50 = vpop.eup %1158 }
 0x118   :  { %v797_v53 = vsel %vm781_vm13, %v1159_v50, 0.0 }
 0x121   :  { %v740_v8 = vpop.xlane.xlu0 %739 }
 0x122   :  { %1160 = vrsqrt.f32 %v740_v8  ;;  %vm782_vm14 = vcmp.gt.f32.partialorder %v740_v8, 0.0 }
 0x123   :  { %1162 = vrsqrt.f32 %v1558_v41 }
 0x127   :  { %v605_v36 = vpop.xlane.xlu1 %604 }
 0x128   :  { %v1565_v16 = vpop.xlane.xlu0 %745  ;;  %v804_v18 = vmul.f32 %v793_v63, %v605_v36 }
 0x129   :  { %1164 = vrsqrt.f32 %v1565_v16  ;;  %vm784_vm3 = vcmp.gt.f32.partialorder %v1565_v16, 0.0 }
 0x12a   :  { %v853_v24 = vmul.f32 %v816_v23, %v804_v18 }
 0x12c   :  { %v608_v49 = vpop.xlane.xlu0 %607  ;;  %870 = vperm.xlu1 %1146, %v853_v24   ;;  %v1161_v30 = vpop.eup %1160 }
 0x12d   :  { %v805_v31 = vmul.f32 %v794_v45, %v608_v49  ;;  %v798_v3 = vsel %vm782_vm14, %v1161_v30, 0.0  ;;  %v1163_v13 = vpop.eup %1162 }
 0x12e   :  { %v611_v29 = vpop.xlane.xlu1 %610  ;;  %v799_v56 = vsel %vm783_vm15, %v1163_v13, 0.0 }
 0x12f   :  { %v854_v35 = vmul.f32 %v820_v27, %v805_v31  ;;  %v806_v54 = vmul.f32 %v795_v14, %v611_v29 }
 0x130   :  { %v614_v22 = vpop.xlane.xlu0 %613 }
 0x131   :  { %873 = vperm.xlu0 %1147, %v854_v35   ;;  %v855_v25 = vmul.f32 %v824_v33, %v806_v54  ;;  %v807_v28 = vmul.f32 %v796_v47, %v614_v22 }
 0x133   :  { %v617_v26 = vpop.xlane.xlu1 %616  ;;  %876 = vperm.xlu1 %1146, %v855_v25   ;;  %v856_v55 = vmul.f32 %v828_v59, %v807_v28  ;;  %v1165_v21 = vpop.eup %1164 }
 0x134   :  { %v808_v60 = vmul.f32 %v797_v53, %v617_v26  ;;  %v800_v62 = vsel %vm784_vm3, %v1165_v21, 0.0 }
 0x136   :  { %v620_v51 = vpop.xlane.xlu0 %619  ;;  %v857_v10 = vmul.f32 %v832_v2, %v808_v60 }
 0x137   :  { %879 = vperm.xlu1 %1146, %v856_v55   ;;  %v809_v12 = vmul.f32 %v798_v3, %v620_v51 }
 0x139   :  { %v623_v0 = vpop.xlane.xlu1 %622  ;;  %v858_v7 = vmul.f32 %v836_v6, %v809_v12 }
 0x13a   :  { %v810_v20 = vmul.f32 %v799_v56, %v623_v0 }
 0x13b   :  { %882 = vperm.xlu1 %1146, %v857_v10  }
 0x13c   :  { %v626_v58 = vpop.xlane.xlu0 %625  ;;  %v859_v5 = vmul.f32 %v840_v57, %v810_v20 }
 0x13d   :  { %v811_v44 = vmul.f32 %v800_v62, %v626_v58 }
 0x13f   :  { %885 = vperm.xlu1 %1146, %v858_v7   ;;  %v860_v15 = vmul.f32 %v844_v34, %v811_v44 }
 0x143   :  { %888 = vperm.xlu1 %1146, %v859_v5  }
 0x147   :  { %891 = vperm.xlu1 %1146, %v860_v15  }
 0x1ab   :  { %v871_v39 = vpop.permute.xlu1 %870 }
 0x1ac   :  { %v898_v63 = vrot.slane %v871_v39, %v1556_v61 }
 0x1b0   :  { %v874_v17 = vpop.permute.xlu0 %873 }
 0x1b1   :  { %v902_v23 = vrot.slane %v874_v17, %v1556_v61 }
 0x1b2   :  { %v877_v19 = vpop.permute.xlu1 %876 }
 0x1b3   :  { %v906_v1 = vrot.slane %v877_v19, %v1556_v61  ;;  %v927_v16 = vsel %vm544_vm0, %v902_v23, %v898_v63 }
 0x1b5   :  { %v928_v37 = vsel %vm547_vm1, %v906_v1, %v927_v16 }
 0x1b6   :  { %v880_v41 = vpop.permute.xlu1 %879 }
 0x1b7   :  { %v910_v36 = vrot.slane %v880_v41, %v1556_v61 }
 0x1b9   :  { %v929_v38 = vsel %vm550_vm2, %v910_v36, %v928_v37 }
 0x1ba   :  { %v883_v8 = vpop.permute.xlu1 %882 }
 0x1bb   :  { %v914_v11 = vrot.slane %v883_v8, %v1556_v61 }
 0x1bd   :  { %v930_v27 = vsel %vm766_vm4, %v914_v11, %v929_v38 }
 0x1be   :  { %v886_v52 = vpop.permute.xlu1 %885 }
 0x1bf   :  { %v918_v18 = vrot.slane %v886_v52, %v1556_v61 }
 0x1c1   :  { %v931_v45 = vsel %vm768_vm5, %v918_v18, %v930_v27 }
 0x1c2   :  { %v889_v46 = vpop.permute.xlu1 %888 }
 0x1c3   :  { %v922_v24 = vrot.slane %v889_v46, %v1556_v61 }
 0x1c5   :  { %v932_v31 = vsel %vm770_vm6, %v922_v24, %v931_v45 }
 0x1c6   :  { %v892_v40 = vpop.permute.xlu1 %891 }
 0x1c7   :  { %v926_v49 = vrot.slane %v892_v40, %v1556_v61 }
 0x1c9   :  { %v933_v32 = vsel %vm772_vm7, %v926_v49, %v932_v31 }
 0x1ca   :  { %936 = vst.msk [vmem:[%s1604_s2] sm:$0xff] %vm935_vm8, %v933_v32 }
 0x1cb   :  { %941 = vsyncpa [#allocation3], 1 }
 0x1cc   :  { %942 = vsyncpa [#allocation5], 1 }

</bundles_post_ra>
